<compile_context>
chip_gen: v6e
topology: v6e:2x2x1
jax: 0.10.0
libtpu: 0.0.40
codegen_flags: <defaults>
</compile_context>

<pallas_src>
import functools
import math

import jax
import jax.numpy as jnp
from jax import lax
from jax.experimental import pallas as pl
from jax.experimental.pallas import tpu as pltpu

# ---- static config -------------------------------------------------------
BATCH = 2          # batch
NEIGH = 8          # neighbor (sequence length for attention)
EMBED = 32         # feature / embed_dim
HEADS = 4          # num_heads
HEAD_DIM = EMBED // HEADS
RESIDUAL = True


def _mhsa_kernel(x_ref, wq_ref, wk_ref, wv_ref, bq_ref, bk_ref, bv_ref,
                 wo_ref, bo_ref, o_ref, ctx_ref,
                 *, b, n, e, h, d, residual):
    """All batch elements of multi-head self-attention in one block.

    x_ref   : (b*n, e)  flattened tokens
    wq/wk/wv: (e, e)    pre-transposed projection weights (x @ w == torch x @ W.T)
    bq/bk/bv: (1, e)    projection biases
    wo_ref  : (e, e)    pre-transposed out_proj weight
    bo_ref  : (1, e)    out_proj bias
    o_ref   : (b*n, e)  output
    ctx_ref : (b*n, e)  f32 VMEM scratch accumulator for per-head contexts
    """
    x = x_ref[...]                                                   # (b*n, e)

    # Q/K/V projections: single lane-dense 2-D matmuls, no transposes.
    q = jnp.dot(x, wq_ref[...], preferred_element_type=jnp.float32) + bq_ref[0]
    k = jnp.dot(x, wk_ref[...], preferred_element_type=jnp.float32) + bk_ref[0]
    v = jnp.dot(x, wv_ref[...], preferred_element_type=jnp.float32) + bv_ref[0]

    scale = 1.0 / math.sqrt(d)

    # Statically unrolled loop over (batch, head): plain 2-D MXU dots only.
    for bi in range(b):
        r0 = bi * n
        for hi in range(h):
            c0 = hi * d
            qh = q[r0:r0 + n, c0:c0 + d]                             # (n, d)
            kh = k[r0:r0 + n, c0:c0 + d]                             # (n, d)
            vh = v[r0:r0 + n, c0:c0 + d]                             # (n, d)

            # scores (n, n): contract on d without materializing kh.T
            s = lax.dot_general(qh, kh, (((1,), (1,)), ((), ())),
                                preferred_element_type=jnp.float32) * scale

            # softmax over keys
            m = jnp.max(s, axis=-1, keepdims=True)
            p = jnp.exp(s - m)
            p = p * pl.reciprocal(jnp.sum(p, axis=-1, keepdims=True),
                                  approx=False)

            # context (n, d) written into its slice of the accumulator
            ctx_ref[r0:r0 + n, c0:c0 + d] = lax.dot_general(
                p, vh, (((1,), (0,)), ((), ())),
                preferred_element_type=jnp.float32)

    # Output projection on the assembled (b*n, e) context.
    out = jnp.dot(ctx_ref[...], wo_ref[...],
                  preferred_element_type=jnp.float32) + bo_ref[0]
    if residual:
        out = out + x

    o_ref[...] = out.astype(o_ref.dtype)


def multi_head_self_attention(x, in_proj_w, in_proj_b, out_proj_w, out_proj_b,
                              *, num_heads=HEADS, residual=RESIDUAL):
    b, n, e = x.shape
    d = e // num_heads

    # Host-side weight prep: split fused in_proj into Wq/Wk/Wv and
    # pre-transpose everything so the kernel never transposes.
    wq = in_proj_w[0 * e:1 * e].T            # (e, e)
    wk = in_proj_w[1 * e:2 * e].T            # (e, e)
    wv = in_proj_w[2 * e:3 * e].T            # (e, e)
    bq = in_proj_b[:, 0 * e:1 * e]           # (1, e)
    bk = in_proj_b[:, 1 * e:2 * e]           # (1, e)
    bv = in_proj_b[:, 2 * e:3 * e]           # (1, e)
    wo = out_proj_w.T                        # (e, e)

    x2 = x.reshape(b * n, e)                 # flatten tokens for the projections

    kernel = functools.partial(_mhsa_kernel, b=b, n=n, e=e, h=num_heads, d=d,
                               residual=residual)

    out = pl.pallas_call(
        kernel,
        out_shape=jax.ShapeDtypeStruct((b * n, e), x.dtype),
        grid_spec=pltpu.PrefetchScalarGridSpec(
            num_scalar_prefetch=0,
            grid=(1,),
            in_specs=[
                pl.BlockSpec((b * n, e), lambda i: (0, 0)),   # x (flattened)
                pl.BlockSpec((e, e), lambda i: (0, 0)),       # wq
                pl.BlockSpec((e, e), lambda i: (0, 0)),       # wk
                pl.BlockSpec((e, e), lambda i: (0, 0)),       # wv
                pl.BlockSpec((1, e), lambda i: (0, 0)),       # bq
                pl.BlockSpec((1, e), lambda i: (0, 0)),       # bk
                pl.BlockSpec((1, e), lambda i: (0, 0)),       # bv
                pl.BlockSpec((e, e), lambda i: (0, 0)),       # wo
                pl.BlockSpec((1, e), lambda i: (0, 0)),       # bo
            ],
            out_specs=pl.BlockSpec((b * n, e), lambda i: (0, 0)),
            scratch_shapes=[pltpu.VMEM((b * n, e), jnp.float32)],
        ),
        compiler_params=pltpu.CompilerParams(
            dimension_semantics=("arbitrary",)),
    )(x2, wq, wk, wv, bq, bk, bv, wo, out_proj_b)

    return out.reshape(b, n, e)


def _reference(x, wi, bi, wo, bo, *, num_heads=HEADS, residual=RESIDUAL):
    """Pure-JAX reference replicating torch.nn.MultiheadAttention forward."""
    b, n, e = x.shape
    d = e // num_heads
    qkv = jnp.einsum('bnf,gf->bng', x, wi) + bi[0]
    q, k, v = qkv[..., :e], qkv[..., e:2 * e], qkv[..., 2 * e:]
    qh = q.reshape(b, n, num_heads, d)
    kh = k.reshape(b, n, num_heads, d)
    vh = v.reshape(b, n, num_heads, d)
    s = jnp.einsum('bnhd,bmhd->bhnm', qh, kh) / math.sqrt(d)
    p = jax.nn.softmax(s, axis=-1)
    ctx = jnp.einsum('bhnm,bmhd->bnhd', p, vh).reshape(b, n, e)
    out = jnp.einsum('bnf,gf->bng', ctx, wo) + bo[0]
    if residual:
        out = out + x
    return out


if __name__ == "__main__":
    key = jax.random.PRNGKey(0)
    kx, kwi, kbi, kwo, kbo = jax.random.split(key, 5)

    x = jax.random.normal(kx, (BATCH, NEIGH, EMBED), dtype=jnp.float32)

    # deterministic synthetic parameters (nn.MultiheadAttention shapes)
    bound = 1.0 / math.sqrt(EMBED)
    in_proj_w = jax.random.uniform(kwi, (3 * EMBED, EMBED), jnp.float32,
                                   minval=-bound, maxval=bound)
    in_proj_b = jax.random.uniform(kbi, (1, 3 * EMBED), jnp.float32,
                                   minval=-bound, maxval=bound)
    out_proj_w = jax.random.uniform(kwo, (EMBED, EMBED), jnp.float32,
                                    minval=-bound, maxval=bound)
    out_proj_b = jax.random.uniform(kbo, (1, EMBED), jnp.float32,
                                    minval=-bound, maxval=bound)

    out = multi_head_self_attention(x, in_proj_w, in_proj_b,
                                    out_proj_w, out_proj_b)
    out = jax.block_until_ready(out)

    ref = _reference(x, in_proj_w, in_proj_b, out_proj_w, out_proj_b)
    assert out.shape == (BATCH, NEIGH, EMBED)
    assert jnp.allclose(out, ref, atol=1e-4, rtol=1e-4), "mismatch vs reference"

    print("KERNEL_OK")
</pallas_src>

<mosaic_0001>
module attributes {stable_mosaic.version = 11 : i64} {
  func.func @_mhsa_kernel(%arg0: i32, %arg1: memref<16x32xf32, #tpu.memory_space<vmem>>, %arg2: memref<32x32xf32, #tpu.memory_space<vmem>>, %arg3: memref<32x32xf32, #tpu.memory_space<vmem>>, %arg4: memref<32x32xf32, #tpu.memory_space<vmem>>, %arg5: memref<1x32xf32, #tpu.memory_space<vmem>>, %arg6: memref<1x32xf32, #tpu.memory_space<vmem>>, %arg7: memref<1x32xf32, #tpu.memory_space<vmem>>, %arg8: memref<32x32xf32, #tpu.memory_space<vmem>>, %arg9: memref<1x32xf32, #tpu.memory_space<vmem>>, %arg10: memref<16x32xf32, #tpu.memory_space<vmem>>, %arg11: memref<16x32xf32, #tpu.memory_space<vmem>>) attributes {dimension_semantics = [#tpu.dimension_semantics<arbitrary>], iteration_bounds = array<i64: 1>, scalar_prefetch = 0 : i64, scratch_operands = 1 : i64, tpu.core_type = #tpu.core_type<tc>, window_params = [{pipeline_mode = #tpu.pipeline_mode<synchronous>, transform_indices = @transform_0, window_bounds = array<i64: 16, 32>}, {pipeline_mode = #tpu.pipeline_mode<synchronous>, transform_indices = @transform_1, window_bounds = array<i64: 32, 32>}, {pipeline_mode = #tpu.pipeline_mode<synchronous>, transform_indices = @transform_2, window_bounds = array<i64: 32, 32>}, {pipeline_mode = #tpu.pipeline_mode<synchronous>, transform_indices = @transform_3, window_bounds = array<i64: 32, 32>}, {pipeline_mode = #tpu.pipeline_mode<synchronous>, transform_indices = @transform_4, window_bounds = array<i64: 1, 32>}, {pipeline_mode = #tpu.pipeline_mode<synchronous>, transform_indices = @transform_5, window_bounds = array<i64: 1, 32>}, {pipeline_mode = #tpu.pipeline_mode<synchronous>, transform_indices = @transform_6, window_bounds = array<i64: 1, 32>}, {pipeline_mode = #tpu.pipeline_mode<synchronous>, transform_indices = @transform_7, window_bounds = array<i64: 32, 32>}, {pipeline_mode = #tpu.pipeline_mode<synchronous>, transform_indices = @transform_8, window_bounds = array<i64: 1, 32>}, {pipeline_mode = #tpu.pipeline_mode<synchronous>, transform_indices = @transform_9, window_bounds = array<i64: 16, 32>}]} {
    %c0 = arith.constant 0 : index
    %c0_0 = arith.constant 0 : index
    %0 = vector.load %arg1[%c0, %c0_0] : memref<16x32xf32, #tpu.memory_space<vmem>>, vector<16x32xf32>
    %c0_1 = arith.constant 0 : index
    %c0_2 = arith.constant 0 : index
    %1 = vector.load %arg2[%c0_1, %c0_2] : memref<32x32xf32, #tpu.memory_space<vmem>>, vector<32x32xf32>
    %cst = arith.constant dense<0.000000e+00> : vector<16x32xf32>
    %2 = tpu.matmul %0, %1, %cst {dimension_numbers = #tpu.dot_dimension_numbers<[1], [0], [0], [1], [0, 0, 1, 1], [], []>} : vector<16x32xf32>, vector<32x32xf32>, vector<16x32xf32> -> vector<16x32xf32>
    %c0_3 = arith.constant 0 : index
    %c0_4 = arith.constant 0 : index
    %3 = vector.load %arg5[%c0_3, %c0_4] : memref<1x32xf32, #tpu.memory_space<vmem>>, vector<1x32xf32>
    %4 = vector.shape_cast %3 : vector<1x32xf32> to vector<32xf32>
    %5 = vector.shape_cast %4 : vector<32xf32> to vector<1x32xf32>
    %6 = vector.broadcast %5 : vector<1x32xf32> to vector<16x32xf32>
    %7 = arith.addf %2, %6 : vector<16x32xf32>
    %c0_5 = arith.constant 0 : index
    %c0_6 = arith.constant 0 : index
    %8 = vector.load %arg3[%c0_5, %c0_6] : memref<32x32xf32, #tpu.memory_space<vmem>>, vector<32x32xf32>
    %cst_7 = arith.constant dense<0.000000e+00> : vector<16x32xf32>
    %9 = tpu.matmul %0, %8, %cst_7 {dimension_numbers = #tpu.dot_dimension_numbers<[1], [0], [0], [1], [0, 0, 1, 1], [], []>} : vector<16x32xf32>, vector<32x32xf32>, vector<16x32xf32> -> vector<16x32xf32>
    %c0_8 = arith.constant 0 : index
    %c0_9 = arith.constant 0 : index
    %10 = vector.load %arg6[%c0_8, %c0_9] : memref<1x32xf32, #tpu.memory_space<vmem>>, vector<1x32xf32>
    %11 = vector.shape_cast %10 : vector<1x32xf32> to vector<32xf32>
    %12 = vector.shape_cast %11 : vector<32xf32> to vector<1x32xf32>
    %13 = vector.broadcast %12 : vector<1x32xf32> to vector<16x32xf32>
    %14 = arith.addf %9, %13 : vector<16x32xf32>
    %c0_10 = arith.constant 0 : index
    %c0_11 = arith.constant 0 : index
    %15 = vector.load %arg4[%c0_10, %c0_11] : memref<32x32xf32, #tpu.memory_space<vmem>>, vector<32x32xf32>
    %cst_12 = arith.constant dense<0.000000e+00> : vector<16x32xf32>
    %16 = tpu.matmul %0, %15, %cst_12 {dimension_numbers = #tpu.dot_dimension_numbers<[1], [0], [0], [1], [0, 0, 1, 1], [], []>} : vector<16x32xf32>, vector<32x32xf32>, vector<16x32xf32> -> vector<16x32xf32>
    %c0_13 = arith.constant 0 : index
    %c0_14 = arith.constant 0 : index
    %17 = vector.load %arg7[%c0_13, %c0_14] : memref<1x32xf32, #tpu.memory_space<vmem>>, vector<1x32xf32>
    %18 = vector.shape_cast %17 : vector<1x32xf32> to vector<32xf32>
    %19 = vector.shape_cast %18 : vector<32xf32> to vector<1x32xf32>
    %20 = vector.broadcast %19 : vector<1x32xf32> to vector<16x32xf32>
    %21 = arith.addf %16, %20 : vector<16x32xf32>
    %22 = vector.extract_strided_slice %7 {offsets = [0, 0], sizes = [8, 8], strides = [1, 1]} : vector<16x32xf32> to vector<8x8xf32>
    %23 = vector.extract_strided_slice %14 {offsets = [0, 0], sizes = [8, 8], strides = [1, 1]} : vector<16x32xf32> to vector<8x8xf32>
    %24 = vector.extract_strided_slice %21 {offsets = [0, 0], sizes = [8, 8], strides = [1, 1]} : vector<16x32xf32> to vector<8x8xf32>
    %cst_15 = arith.constant dense<0.000000e+00> : vector<8x8xf32>
    %25 = tpu.matmul %22, %23, %cst_15 {dimension_numbers = #tpu.dot_dimension_numbers<[1], [1], [0], [0], [0, 0, 1, 0], [], []>} : vector<8x8xf32>, vector<8x8xf32>, vector<8x8xf32> -> vector<8x8xf32>
    %cst_16 = arith.constant 0.353553385 : f32
    %26 = vector.broadcast %cst_16 : f32 to vector<8x8xf32>
    %27 = arith.mulf %25, %26 : vector<8x8xf32>
    %cst_17 = arith.constant dense<0xFF800000> : vector<8xf32>
    %28 = vector.multi_reduction <maximumf>, %27, %cst_17 [1] : vector<8x8xf32> to vector<8xf32>
    %29 = vector.shape_cast %28 : vector<8xf32> to vector<8x1xf32>
    %30 = vector.broadcast %29 : vector<8x1xf32> to vector<8x8xf32>
    %31 = arith.subf %27, %30 : vector<8x8xf32>
    %32 = math.exp %31 : vector<8x8xf32>
    %cst_18 = arith.constant dense<0.000000e+00> : vector<8xf32>
    %33 = vector.multi_reduction <add>, %32, %cst_18 [1] : vector<8x8xf32> to vector<8xf32>
    %34 = vector.shape_cast %33 : vector<8xf32> to vector<8x1xf32>
    %35 = tpu.reciprocal %34 : vector<8x1xf32> -> vector<8x1xf32>
    %36 = vector.broadcast %35 : vector<8x1xf32> to vector<8x8xf32>
    %37 = arith.mulf %32, %36 : vector<8x8xf32>
    %cst_19 = arith.constant dense<0.000000e+00> : vector<8x8xf32>
    %38 = tpu.matmul %37, %24, %cst_19 {dimension_numbers = #tpu.dot_dimension_numbers<[1], [0], [0], [1], [0, 0, 1, 1], [], []>} : vector<8x8xf32>, vector<8x8xf32>, vector<8x8xf32> -> vector<8x8xf32>
    %c0_20 = arith.constant 0 : index
    %c0_21 = arith.constant 0 : index
    %39 = vector.load %arg11[%c0_20, %c0_21] : memref<16x32xf32, #tpu.memory_space<vmem>>, vector<8x8xf32>
    tpu.vector_store %arg11[%c0_20, %c0_21], %38 {strides = array<i32>} : memref<16x32xf32, #tpu.memory_space<vmem>>, vector<8x8xf32>,
    %40 = vector.extract_strided_slice %7 {offsets = [0, 8], sizes = [8, 8], strides = [1, 1]} : vector<16x32xf32> to vector<8x8xf32>
    %41 = vector.extract_strided_slice %14 {offsets = [0, 8], sizes = [8, 8], strides = [1, 1]} : vector<16x32xf32> to vector<8x8xf32>
    %42 = vector.extract_strided_slice %21 {offsets = [0, 8], sizes = [8, 8], strides = [1, 1]} : vector<16x32xf32> to vector<8x8xf32>
    %cst_22 = arith.constant dense<0.000000e+00> : vector<8x8xf32>
    %43 = tpu.matmul %40, %41, %cst_22 {dimension_numbers = #tpu.dot_dimension_numbers<[1], [1], [0], [0], [0, 0, 1, 0], [], []>} : vector<8x8xf32>, vector<8x8xf32>, vector<8x8xf32> -> vector<8x8xf32>
    %cst_23 = arith.constant 0.353553385 : f32
    %44 = vector.broadcast %cst_23 : f32 to vector<8x8xf32>
    %45 = arith.mulf %43, %44 : vector<8x8xf32>
    %cst_24 = arith.constant dense<0xFF800000> : vector<8xf32>
    %46 = vector.multi_reduction <maximumf>, %45, %cst_24 [1] : vector<8x8xf32> to vector<8xf32>
    %47 = vector.shape_cast %46 : vector<8xf32> to vector<8x1xf32>
    %48 = vector.broadcast %47 : vector<8x1xf32> to vector<8x8xf32>
    %49 = arith.subf %45, %48 : vector<8x8xf32>
    %50 = math.exp %49 : vector<8x8xf32>
    %cst_25 = arith.constant dense<0.000000e+00> : vector<8xf32>
    %51 = vector.multi_reduction <add>, %50, %cst_25 [1] : vector<8x8xf32> to vector<8xf32>
    %52 = vector.shape_cast %51 : vector<8xf32> to vector<8x1xf32>
    %53 = tpu.reciprocal %52 : vector<8x1xf32> -> vector<8x1xf32>
    %54 = vector.broadcast %53 : vector<8x1xf32> to vector<8x8xf32>
    %55 = arith.mulf %50, %54 : vector<8x8xf32>
    %cst_26 = arith.constant dense<0.000000e+00> : vector<8x8xf32>
    %56 = tpu.matmul %55, %42, %cst_26 {dimension_numbers = #tpu.dot_dimension_numbers<[1], [0], [0], [1], [0, 0, 1, 1], [], []>} : vector<8x8xf32>, vector<8x8xf32>, vector<8x8xf32> -> vector<8x8xf32>
    %c0_27 = arith.constant 0 : index
    %c8 = arith.constant 8 : index
    %57 = vector.load %arg11[%c0_27, %c8] : memref<16x32xf32, #tpu.memory_space<vmem>>, vector<8x8xf32>
    tpu.vector_store %arg11[%c0_27, %c8], %56 {strides = array<i32>} : memref<16x32xf32, #tpu.memory_space<vmem>>, vector<8x8xf32>,
    %58 = vector.extract_strided_slice %7 {offsets = [0, 16], sizes = [8, 8], strides = [1, 1]} : vector<16x32xf32> to vector<8x8xf32>
    %59 = vector.extract_strided_slice %14 {offsets = [0, 16], sizes = [8, 8], strides = [1, 1]} : vector<16x32xf32> to vector<8x8xf32>
    %60 = vector.extract_strided_slice %21 {offsets = [0, 16], sizes = [8, 8], strides = [1, 1]} : vector<16x32xf32> to vector<8x8xf32>
    %cst_28 = arith.constant dense<0.000000e+00> : vector<8x8xf32>
    %61 = tpu.matmul %58, %59, %cst_28 {dimension_numbers = #tpu.dot_dimension_numbers<[1], [1], [0], [0], [0, 0, 1, 0], [], []>} : vector<8x8xf32>, vector<8x8xf32>, vector<8x8xf32> -> vector<8x8xf32>
    %cst_29 = arith.constant 0.353553385 : f32
    %62 = vector.broadcast %cst_29 : f32 to vector<8x8xf32>
    %63 = arith.mulf %61, %62 : vector<8x8xf32>
    %cst_30 = arith.constant dense<0xFF800000> : vector<8xf32>
    %64 = vector.multi_reduction <maximumf>, %63, %cst_30 [1] : vector<8x8xf32> to vector<8xf32>
    %65 = vector.shape_cast %64 : vector<8xf32> to vector<8x1xf32>
    %66 = vector.broadcast %65 : vector<8x1xf32> to vector<8x8xf32>
    %67 = arith.subf %63, %66 : vector<8x8xf32>
    %68 = math.exp %67 : vector<8x8xf32>
    %cst_31 = arith.constant dense<0.000000e+00> : vector<8xf32>
    %69 = vector.multi_reduction <add>, %68, %cst_31 [1] : vector<8x8xf32> to vector<8xf32>
    %70 = vector.shape_cast %69 : vector<8xf32> to vector<8x1xf32>
    %71 = tpu.reciprocal %70 : vector<8x1xf32> -> vector<8x1xf32>
    %72 = vector.broadcast %71 : vector<8x1xf32> to vector<8x8xf32>
    %73 = arith.mulf %68, %72 : vector<8x8xf32>
    %cst_32 = arith.constant dense<0.000000e+00> : vector<8x8xf32>
    %74 = tpu.matmul %73, %60, %cst_32 {dimension_numbers = #tpu.dot_dimension_numbers<[1], [0], [0], [1], [0, 0, 1, 1], [], []>} : vector<8x8xf32>, vector<8x8xf32>, vector<8x8xf32> -> vector<8x8xf32>
    %c0_33 = arith.constant 0 : index
    %c16 = arith.constant 16 : index
    %75 = vector.load %arg11[%c0_33, %c16] : memref<16x32xf32, #tpu.memory_space<vmem>>, vector<8x8xf32>
    tpu.vector_store %arg11[%c0_33, %c16], %74 {strides = array<i32>} : memref<16x32xf32, #tpu.memory_space<vmem>>, vector<8x8xf32>,
    %76 = vector.extract_strided_slice %7 {offsets = [0, 24], sizes = [8, 8], strides = [1, 1]} : vector<16x32xf32> to vector<8x8xf32>
    %77 = vector.extract_strided_slice %14 {offsets = [0, 24], sizes = [8, 8], strides = [1, 1]} : vector<16x32xf32> to vector<8x8xf32>
    %78 = vector.extract_strided_slice %21 {offsets = [0, 24], sizes = [8, 8], strides = [1, 1]} : vector<16x32xf32> to vector<8x8xf32>
    %cst_34 = arith.constant dense<0.000000e+00> : vector<8x8xf32>
    %79 = tpu.matmul %76, %77, %cst_34 {dimension_numbers = #tpu.dot_dimension_numbers<[1], [1], [0], [0], [0, 0, 1, 0], [], []>} : vector<8x8xf32>, vector<8x8xf32>, vector<8x8xf32> -> vector<8x8xf32>
    %cst_35 = arith.constant 0.353553385 : f32
    %80 = vector.broadcast %cst_35 : f32 to vector<8x8xf32>
    %81 = arith.mulf %79, %80 : vector<8x8xf32>
    %cst_36 = arith.constant dense<0xFF800000> : vector<8xf32>
    %82 = vector.multi_reduction <maximumf>, %81, %cst_36 [1] : vector<8x8xf32> to vector<8xf32>
    %83 = vector.shape_cast %82 : vector<8xf32> to vector<8x1xf32>
    %84 = vector.broadcast %83 : vector<8x1xf32> to vector<8x8xf32>
    %85 = arith.subf %81, %84 : vector<8x8xf32>
    %86 = math.exp %85 : vector<8x8xf32>
    %cst_37 = arith.constant dense<0.000000e+00> : vector<8xf32>
    %87 = vector.multi_reduction <add>, %86, %cst_37 [1] : vector<8x8xf32> to vector<8xf32>
    %88 = vector.shape_cast %87 : vector<8xf32> to vector<8x1xf32>
    %89 = tpu.reciprocal %88 : vector<8x1xf32> -> vector<8x1xf32>
    %90 = vector.broadcast %89 : vector<8x1xf32> to vector<8x8xf32>
    %91 = arith.mulf %86, %90 : vector<8x8xf32>
    %cst_38 = arith.constant dense<0.000000e+00> : vector<8x8xf32>
    %92 = tpu.matmul %91, %78, %cst_38 {dimension_numbers = #tpu.dot_dimension_numbers<[1], [0], [0], [1], [0, 0, 1, 1], [], []>} : vector<8x8xf32>, vector<8x8xf32>, vector<8x8xf32> -> vector<8x8xf32>
    %c0_39 = arith.constant 0 : index
    %c24 = arith.constant 24 : index
    %93 = vector.load %arg11[%c0_39, %c24] : memref<16x32xf32, #tpu.memory_space<vmem>>, vector<8x8xf32>
    tpu.vector_store %arg11[%c0_39, %c24], %92 {strides = array<i32>} : memref<16x32xf32, #tpu.memory_space<vmem>>, vector<8x8xf32>,
    %94 = vector.extract_strided_slice %7 {offsets = [8, 0], sizes = [8, 8], strides = [1, 1]} : vector<16x32xf32> to vector<8x8xf32>
    %95 = vector.extract_strided_slice %14 {offsets = [8, 0], sizes = [8, 8], strides = [1, 1]} : vector<16x32xf32> to vector<8x8xf32>
    %96 = vector.extract_strided_slice %21 {offsets = [8, 0], sizes = [8, 8], strides = [1, 1]} : vector<16x32xf32> to vector<8x8xf32>
    %cst_40 = arith.constant dense<0.000000e+00> : vector<8x8xf32>
    %97 = tpu.matmul %94, %95, %cst_40 {dimension_numbers = #tpu.dot_dimension_numbers<[1], [1], [0], [0], [0, 0, 1, 0], [], []>} : vector<8x8xf32>, vector<8x8xf32>, vector<8x8xf32> -> vector<8x8xf32>
    %cst_41 = arith.constant 0.353553385 : f32
    %98 = vector.broadcast %cst_41 : f32 to vector<8x8xf32>
    %99 = arith.mulf %97, %98 : vector<8x8xf32>
    %cst_42 = arith.constant dense<0xFF800000> : vector<8xf32>
    %100 = vector.multi_reduction <maximumf>, %99, %cst_42 [1] : vector<8x8xf32> to vector<8xf32>
    %101 = vector.shape_cast %100 : vector<8xf32> to vector<8x1xf32>
    %102 = vector.broadcast %101 : vector<8x1xf32> to vector<8x8xf32>
    %103 = arith.subf %99, %102 : vector<8x8xf32>
    %104 = math.exp %103 : vector<8x8xf32>
    %cst_43 = arith.constant dense<0.000000e+00> : vector<8xf32>
    %105 = vector.multi_reduction <add>, %104, %cst_43 [1] : vector<8x8xf32> to vector<8xf32>
    %106 = vector.shape_cast %105 : vector<8xf32> to vector<8x1xf32>
    %107 = tpu.reciprocal %106 : vector<8x1xf32> -> vector<8x1xf32>
    %108 = vector.broadcast %107 : vector<8x1xf32> to vector<8x8xf32>
    %109 = arith.mulf %104, %108 : vector<8x8xf32>
    %cst_44 = arith.constant dense<0.000000e+00> : vector<8x8xf32>
    %110 = tpu.matmul %109, %96, %cst_44 {dimension_numbers = #tpu.dot_dimension_numbers<[1], [0], [0], [1], [0, 0, 1, 1], [], []>} : vector<8x8xf32>, vector<8x8xf32>, vector<8x8xf32> -> vector<8x8xf32>
    %c8_45 = arith.constant 8 : index
    %c0_46 = arith.constant 0 : index
    %111 = vector.load %arg11[%c8_45, %c0_46] : memref<16x32xf32, #tpu.memory_space<vmem>>, vector<8x8xf32>
    tpu.vector_store %arg11[%c8_45, %c0_46], %110 {strides = array<i32>} : memref<16x32xf32, #tpu.memory_space<vmem>>, vector<8x8xf32>,
    %112 = vector.extract_strided_slice %7 {offsets = [8, 8], sizes = [8, 8], strides = [1, 1]} : vector<16x32xf32> to vector<8x8xf32>
    %113 = vector.extract_strided_slice %14 {offsets = [8, 8], sizes = [8, 8], strides = [1, 1]} : vector<16x32xf32> to vector<8x8xf32>
    %114 = vector.extract_strided_slice %21 {offsets = [8, 8], sizes = [8, 8], strides = [1, 1]} : vector<16x32xf32> to vector<8x8xf32>
    %cst_47 = arith.constant dense<0.000000e+00> : vector<8x8xf32>
    %115 = tpu.matmul %112, %113, %cst_47 {dimension_numbers = #tpu.dot_dimension_numbers<[1], [1], [0], [0], [0, 0, 1, 0], [], []>} : vector<8x8xf32>, vector<8x8xf32>, vector<8x8xf32> -> vector<8x8xf32>
    %cst_48 = arith.constant 0.353553385 : f32
    %116 = vector.broadcast %cst_48 : f32 to vector<8x8xf32>
    %117 = arith.mulf %115, %116 : vector<8x8xf32>
    %cst_49 = arith.constant dense<0xFF800000> : vector<8xf32>
    %118 = vector.multi_reduction <maximumf>, %117, %cst_49 [1] : vector<8x8xf32> to vector<8xf32>
    %119 = vector.shape_cast %118 : vector<8xf32> to vector<8x1xf32>
    %120 = vector.broadcast %119 : vector<8x1xf32> to vector<8x8xf32>
    %121 = arith.subf %117, %120 : vector<8x8xf32>
    %122 = math.exp %121 : vector<8x8xf32>
    %cst_50 = arith.constant dense<0.000000e+00> : vector<8xf32>
    %123 = vector.multi_reduction <add>, %122, %cst_50 [1] : vector<8x8xf32> to vector<8xf32>
    %124 = vector.shape_cast %123 : vector<8xf32> to vector<8x1xf32>
    %125 = tpu.reciprocal %124 : vector<8x1xf32> -> vector<8x1xf32>
    %126 = vector.broadcast %125 : vector<8x1xf32> to vector<8x8xf32>
    %127 = arith.mulf %122, %126 : vector<8x8xf32>
    %cst_51 = arith.constant dense<0.000000e+00> : vector<8x8xf32>
    %128 = tpu.matmul %127, %114, %cst_51 {dimension_numbers = #tpu.dot_dimension_numbers<[1], [0], [0], [1], [0, 0, 1, 1], [], []>} : vector<8x8xf32>, vector<8x8xf32>, vector<8x8xf32> -> vector<8x8xf32>
    %c8_52 = arith.constant 8 : index
    %c8_53 = arith.constant 8 : index
    %129 = vector.load %arg11[%c8_52, %c8_53] : memref<16x32xf32, #tpu.memory_space<vmem>>, vector<8x8xf32>
    tpu.vector_store %arg11[%c8_52, %c8_53], %128 {strides = array<i32>} : memref<16x32xf32, #tpu.memory_space<vmem>>, vector<8x8xf32>,
    %130 = vector.extract_strided_slice %7 {offsets = [8, 16], sizes = [8, 8], strides = [1, 1]} : vector<16x32xf32> to vector<8x8xf32>
    %131 = vector.extract_strided_slice %14 {offsets = [8, 16], sizes = [8, 8], strides = [1, 1]} : vector<16x32xf32> to vector<8x8xf32>
    %132 = vector.extract_strided_slice %21 {offsets = [8, 16], sizes = [8, 8], strides = [1, 1]} : vector<16x32xf32> to vector<8x8xf32>
    %cst_54 = arith.constant dense<0.000000e+00> : vector<8x8xf32>
    %133 = tpu.matmul %130, %131, %cst_54 {dimension_numbers = #tpu.dot_dimension_numbers<[1], [1], [0], [0], [0, 0, 1, 0], [], []>} : vector<8x8xf32>, vector<8x8xf32>, vector<8x8xf32> -> vector<8x8xf32>
    %cst_55 = arith.constant 0.353553385 : f32
    %134 = vector.broadcast %cst_55 : f32 to vector<8x8xf32>
    %135 = arith.mulf %133, %134 : vector<8x8xf32>
    %cst_56 = arith.constant dense<0xFF800000> : vector<8xf32>
    %136 = vector.multi_reduction <maximumf>, %135, %cst_56 [1] : vector<8x8xf32> to vector<8xf32>
    %137 = vector.shape_cast %136 : vector<8xf32> to vector<8x1xf32>
    %138 = vector.broadcast %137 : vector<8x1xf32> to vector<8x8xf32>
    %139 = arith.subf %135, %138 : vector<8x8xf32>
    %140 = math.exp %139 : vector<8x8xf32>
    %cst_57 = arith.constant dense<0.000000e+00> : vector<8xf32>
    %141 = vector.multi_reduction <add>, %140, %cst_57 [1] : vector<8x8xf32> to vector<8xf32>
    %142 = vector.shape_cast %141 : vector<8xf32> to vector<8x1xf32>
    %143 = tpu.reciprocal %142 : vector<8x1xf32> -> vector<8x1xf32>
    %144 = vector.broadcast %143 : vector<8x1xf32> to vector<8x8xf32>
    %145 = arith.mulf %140, %144 : vector<8x8xf32>
    %cst_58 = arith.constant dense<0.000000e+00> : vector<8x8xf32>
    %146 = tpu.matmul %145, %132, %cst_58 {dimension_numbers = #tpu.dot_dimension_numbers<[1], [0], [0], [1], [0, 0, 1, 1], [], []>} : vector<8x8xf32>, vector<8x8xf32>, vector<8x8xf32> -> vector<8x8xf32>
    %c8_59 = arith.constant 8 : index
    %c16_60 = arith.constant 16 : index
    %147 = vector.load %arg11[%c8_59, %c16_60] : memref<16x32xf32, #tpu.memory_space<vmem>>, vector<8x8xf32>
    tpu.vector_store %arg11[%c8_59, %c16_60], %146 {strides = array<i32>} : memref<16x32xf32, #tpu.memory_space<vmem>>, vector<8x8xf32>,
    %148 = vector.extract_strided_slice %7 {offsets = [8, 24], sizes = [8, 8], strides = [1, 1]} : vector<16x32xf32> to vector<8x8xf32>
    %149 = vector.extract_strided_slice %14 {offsets = [8, 24], sizes = [8, 8], strides = [1, 1]} : vector<16x32xf32> to vector<8x8xf32>
    %150 = vector.extract_strided_slice %21 {offsets = [8, 24], sizes = [8, 8], strides = [1, 1]} : vector<16x32xf32> to vector<8x8xf32>
    %cst_61 = arith.constant dense<0.000000e+00> : vector<8x8xf32>
    %151 = tpu.matmul %148, %149, %cst_61 {dimension_numbers = #tpu.dot_dimension_numbers<[1], [1], [0], [0], [0, 0, 1, 0], [], []>} : vector<8x8xf32>, vector<8x8xf32>, vector<8x8xf32> -> vector<8x8xf32>
    %cst_62 = arith.constant 0.353553385 : f32
    %152 = vector.broadcast %cst_62 : f32 to vector<8x8xf32>
    %153 = arith.mulf %151, %152 : vector<8x8xf32>
    %cst_63 = arith.constant dense<0xFF800000> : vector<8xf32>
    %154 = vector.multi_reduction <maximumf>, %153, %cst_63 [1] : vector<8x8xf32> to vector<8xf32>
    %155 = vector.shape_cast %154 : vector<8xf32> to vector<8x1xf32>
    %156 = vector.broadcast %155 : vector<8x1xf32> to vector<8x8xf32>
    %157 = arith.subf %153, %156 : vector<8x8xf32>
    %158 = math.exp %157 : vector<8x8xf32>
    %cst_64 = arith.constant dense<0.000000e+00> : vector<8xf32>
    %159 = vector.multi_reduction <add>, %158, %cst_64 [1] : vector<8x8xf32> to vector<8xf32>
    %160 = vector.shape_cast %159 : vector<8xf32> to vector<8x1xf32>
    %161 = tpu.reciprocal %160 : vector<8x1xf32> -> vector<8x1xf32>
    %162 = vector.broadcast %161 : vector<8x1xf32> to vector<8x8xf32>
    %163 = arith.mulf %158, %162 : vector<8x8xf32>
    %cst_65 = arith.constant dense<0.000000e+00> : vector<8x8xf32>
    %164 = tpu.matmul %163, %150, %cst_65 {dimension_numbers = #tpu.dot_dimension_numbers<[1], [0], [0], [1], [0, 0, 1, 1], [], []>} : vector<8x8xf32>, vector<8x8xf32>, vector<8x8xf32> -> vector<8x8xf32>
    %c8_66 = arith.constant 8 : index
    %c24_67 = arith.constant 24 : index
    %165 = vector.load %arg11[%c8_66, %c24_67] : memref<16x32xf32, #tpu.memory_space<vmem>>, vector<8x8xf32>
    tpu.vector_store %arg11[%c8_66, %c24_67], %164 {strides = array<i32>} : memref<16x32xf32, #tpu.memory_space<vmem>>, vector<8x8xf32>,
    %c0_68 = arith.constant 0 : index
    %c0_69 = arith.constant 0 : index
    %166 = vector.load %arg11[%c0_68, %c0_69] : memref<16x32xf32, #tpu.memory_space<vmem>>, vector<16x32xf32>
    %c0_70 = arith.constant 0 : index
    %c0_71 = arith.constant 0 : index
    %167 = vector.load %arg8[%c0_70, %c0_71] : memref<32x32xf32, #tpu.memory_space<vmem>>, vector<32x32xf32>
    %cst_72 = arith.constant dense<0.000000e+00> : vector<16x32xf32>
    %168 = tpu.matmul %166, %167, %cst_72 {dimension_numbers = #tpu.dot_dimension_numbers<[1], [0], [0], [1], [0, 0, 1, 1], [], []>} : vector<16x32xf32>, vector<32x32xf32>, vector<16x32xf32> -> vector<16x32xf32>
    %c0_73 = arith.constant 0 : index
    %c0_74 = arith.constant 0 : index
    %169 = vector.load %arg9[%c0_73, %c0_74] : memref<1x32xf32, #tpu.memory_space<vmem>>, vector<1x32xf32>
    %170 = vector.shape_cast %169 : vector<1x32xf32> to vector<32xf32>
    %171 = vector.shape_cast %170 : vector<32xf32> to vector<1x32xf32>
    %172 = vector.broadcast %171 : vector<1x32xf32> to vector<16x32xf32>
    %173 = arith.addf %168, %172 : vector<16x32xf32>
    %174 = arith.addf %173, %0 : vector<16x32xf32>
    %c0_75 = arith.constant 0 : index
    %c0_76 = arith.constant 0 : index
    %175 = vector.load %arg10[%c0_75, %c0_76] : memref<16x32xf32, #tpu.memory_space<vmem>>, vector<16x32xf32>
    tpu.vector_store %arg10[%c0_75, %c0_76], %174 {strides = array<i32>} : memref<16x32xf32, #tpu.memory_space<vmem>>, vector<16x32xf32>,
    return
  }
  func.func @transform_0(%arg0: i32) -> (i32, i32) {
    %c0_i32 = arith.constant 0 : i32
    %c0_i32_0 = arith.constant 0 : i32
    %c0_i32_1 = arith.constant 0 : i32
    return %c0_i32, %c0_i32_0 : i32, i32
  }
  func.func @transform_1(%arg0: i32) -> (i32, i32) {
    %c0_i32 = arith.constant 0 : i32
    %c0_i32_0 = arith.constant 0 : i32
    %c0_i32_1 = arith.constant 0 : i32
    return %c0_i32, %c0_i32_0 : i32, i32
  }
  func.func @transform_2(%arg0: i32) -> (i32, i32) {
    %c0_i32 = arith.constant 0 : i32
    %c0_i32_0 = arith.constant 0 : i32
    %c0_i32_1 = arith.constant 0 : i32
    return %c0_i32, %c0_i32_0 : i32, i32
  }
  func.func @transform_3(%arg0: i32) -> (i32, i32) {
    %c0_i32 = arith.constant 0 : i32
    %c0_i32_0 = arith.constant 0 : i32
    %c0_i32_1 = arith.constant 0 : i32
    return %c0_i32, %c0_i32_0 : i32, i32
  }
  func.func @transform_4(%arg0: i32) -> (i32, i32) {
    %c0_i32 = arith.constant 0 : i32
    %c0_i32_0 = arith.constant 0 : i32
    %c0_i32_1 = arith.constant 0 : i32
    return %c0_i32, %c0_i32_0 : i32, i32
  }
  func.func @transform_5(%arg0: i32) -> (i32, i32) {
    %c0_i32 = arith.constant 0 : i32
    %c0_i32_0 = arith.constant 0 : i32
    %c0_i32_1 = arith.constant 0 : i32
    return %c0_i32, %c0_i32_0 : i32, i32
  }
  func.func @transform_6(%arg0: i32) -> (i32, i32) {
    %c0_i32 = arith.constant 0 : i32
    %c0_i32_0 = arith.constant 0 : i32
    %c0_i32_1 = arith.constant 0 : i32
    return %c0_i32, %c0_i32_0 : i32, i32
  }
  func.func @transform_7(%arg0: i32) -> (i32, i32) {
    %c0_i32 = arith.constant 0 : i32
    %c0_i32_0 = arith.constant 0 : i32
    %c0_i32_1 = arith.constant 0 : i32
    return %c0_i32, %c0_i32_0 : i32, i32
  }
  func.func @transform_8(%arg0: i32) -> (i32, i32) {
    %c0_i32 = arith.constant 0 : i32
    %c0_i32_0 = arith.constant 0 : i32
    %c0_i32_1 = arith.constant 0 : i32
    return %c0_i32, %c0_i32_0 : i32, i32
  }
  func.func @transform_9(%arg0: i32) -> (i32, i32) {
    %c0_i32 = arith.constant 0 : i32
    %c0_i32_0 = arith.constant 0 : i32
    %c0_i32_1 = arith.constant 0 : i32
    return %c0_i32, %c0_i32_0 : i32, i32
  }
}

</mosaic_0001>

<bundles_post_ra>
// kernel: tpu_custom_call.1
= control target key start
LH: loop header
LB: loop body
LE: loop exit
PB: predicated region body
PF: predicated region fallthrough
CT: control target
= control target key end

     0   :  { %14 = vsyncpa [#allocation4], 0  ;;  %s2519_s0 = inlined_call_operand.hbm [shape: f32[16,32], index: 0, kind: input, shape index: {}]   ;;  %s2520_s1 = inlined_call_operand.hbm [shape: f32[32,32], index: 1, kind: input, shape index: {}]   ;;  %s2521_s2 = inlined_call_operand.hbm [shape: f32[32,32], index: 2, kind: input, shape index: {}]   ;;  %s2522_s3 = inlined_call_operand.hbm [shape: f32[32,32], index: 3, kind: input, shape index: {}]   ;;  %s2523_s4 = inlined_call_operand.vmem [shape: f32[1,32], index: 4, kind: input, shape index: {}]   ;;  %s2524_s5 = inlined_call_operand.vmem [shape: f32[1,32], index: 5, kind: input, shape index: {}]   ;;  %s2525_s6 = inlined_call_operand.vmem [shape: f32[1,32], index: 6, kind: input, shape index: {}]   ;;  %s2526_s7 = inlined_call_operand.hbm [shape: f32[32,32], index: 7, kind: input, shape index: {}]   ;;  %s2527_s8 = inlined_call_operand.vmem [shape: f32[1,32], index: 8, kind: input, shape index: {}]   ;;  %s2528_s9 = inlined_call_operand.hbm [shape: f32[16,32], index: 9, kind: output, shape index: {}]  }
   0x1   :  { %15 = vsyncpa [#allocation7], 0 }
   0x2   :  { %16 = vsyncpa [#allocation10], 0 }
   0x3   :  { %17 = vsyncpa [#allocation5], 0  ;;  %s2232_s30 = smov [#allocation6]   ;;  %s2233_s11 = smov [#allocation9]  }
   0x4   :  { %s35_s10 = sshll.u32 %s2232_s30, 4  ;;  %s59_s12 = sshll.u32 %s2233_s11, 4  ;;  %s36_s10 = int_to_ptr.vmem [resolvable:$true] %s35_s10  ;;  %s60_s12 = int_to_ptr.vmem [resolvable:$true] %s59_s12 }
   0x5   :  { %s2112_s13 = scalar_lea.vmem %s36_s10, 512  ;;  %p2117_p1 = scmp.lt.s32.totalorder %s36_s10, %s36_s10 }
   0x6   :  { %p2113_p0 = scmp.ne.s32.totalorder %s36_s10, %s2112_s13  ;;  %p2118_p2 = scmp.lt.s32.totalorder %s2112_s13, %s2112_s13 }
   0x8   :  { %p2119_p3 = por %p2118_p2, %p2117_p1 }
   0xa   :  { %p2120_p4 = pnand %p2119_p3, %p2113_p0 }
   0xc   :  { %2123 = shalt.err (!%p2120_p4)
}
   0xd   :  { %s2234_s14 = smov 128   ;;  %s2235_s15 = smov 8  }
   0xe   :  { %41 = dma.hbm_to_vmem [thread:$0]  %s2520_s1, 512, %s36_s10, [#allocation7], %s2234_s14, %s2234_s14, %s2235_s15  }
   0xf   :  { %s2132_s18 = scalar_lea.vmem %s60_s12, 512  ;;  %p2137_p6 = scmp.lt.s32.totalorder %s60_s12, %s60_s12 }
  0x10   :  { %p2133_p5 = scmp.ne.s32.totalorder %s60_s12, %s2132_s18  ;;  %p2138_p7 = scmp.lt.s32.totalorder %s2132_s18, %s2132_s18 }
  0x12   :  { %p2139_p8 = por %p2138_p7, %p2137_p6 }
  0x14   :  { %p2140_p9 = pnand %p2139_p8, %p2133_p5 }
  0x16   :  { %2143 = shalt.err (!%p2140_p9)
}
  0x17   :  { %65 = dma.hbm_to_vmem [thread:$0]  %s2522_s3, 512, %s60_s12, [#allocation10], %s2234_s14, %s2234_s14, %s2235_s15  }
  0x18   :  { %s2236_s21 = smov [#allocation3]   ;;  %s2237_s23 = smov [#allocation8]  }
  0x19   :  { %s23_s22 = sshll.u32 %s2236_s21, 4  ;;  %s47_s24 = sshll.u32 %s2237_s23, 4  ;;  %s24_s22 = int_to_ptr.vmem [resolvable:$true] %s23_s22  ;;  %s48_s24 = int_to_ptr.vmem [resolvable:$true] %s47_s24 }
  0x1a   :  { %s2152_s1 = scalar_lea.vmem %s24_s22, 256  ;;  %p2157_p11 = scmp.lt.s32.totalorder %s24_s22, %s24_s22 }
  0x1b   :  { %p2153_p10 = scmp.ne.s32.totalorder %s24_s22, %s2152_s1  ;;  %p2158_p12 = scmp.lt.s32.totalorder %s2152_s1, %s2152_s1 }
  0x1d   :  { %p2159_p13 = por %p2158_p12, %p2157_p11 }
  0x1f   :  { %p2160_p0 = pnand %p2159_p13, %p2153_p10 }
  0x21   :  { %2163 = shalt.err (!%p2160_p0)
}
  0x22   :  { %29 = dma.hbm_to_vmem [thread:$0]  %s2519_s0, 256, %s24_s22, [#allocation4], %s2234_s14, %s2234_s14, %s2235_s15  }
  0x23   :  { %s2172_s3 = scalar_lea.vmem %s48_s24, 512  ;;  %p2177_p2 = scmp.lt.s32.totalorder %s48_s24, %s48_s24 }
  0x24   :  { %p2173_p1 = scmp.ne.s32.totalorder %s48_s24, %s2172_s3  ;;  %p2178_p3 = scmp.lt.s32.totalorder %s2172_s3, %s2172_s3 }
  0x26   :  { %p2179_p4 = por %p2178_p3, %p2177_p2 }
  0x28   :  { %p2180_p5 = pnand %p2179_p4, %p2173_p1 }
  0x2a   :  { %2183 = shalt.err (!%p2180_p5)
}
  0x2b   :  { %53 = dma.hbm_to_vmem [thread:$0]  %s2521_s2, 512, %s48_s24, [#allocation7], %s2234_s14, %s2234_s14, %s2235_s15  }
  0x2c   :  { %s2238_s29 = smov [#allocation11]  }
  0x2d   :  { %s77_s30 = sshll.u32 %s2238_s29, 4  ;;  %s78_s30 = int_to_ptr.vmem [resolvable:$true] %s77_s30 }
  0x2e   :  { %s2192_s10 = scalar_lea.vmem %s78_s30, 512  ;;  %p2197_p7 = scmp.lt.s32.totalorder %s78_s30, %s78_s30 }
  0x2f   :  { %p2193_p6 = scmp.ne.s32.totalorder %s78_s30, %s2192_s10  ;;  %p2198_p8 = scmp.lt.s32.totalorder %s2192_s10, %s2192_s10 }
  0x31   :  { %p2199_p9 = por %p2198_p8, %p2197_p7 }
  0x33   :  { %p2200_p10 = pnand %p2199_p9, %p2193_p6 }
  0x35   :  { %2203 = shalt.err (!%p2200_p10)
}
  0x36   :  { %83 = dma.hbm_to_vmem [thread:$0]  %s2526_s7, 512, %s78_s30, [#allocation10], %s2234_s14, %s2234_s14, %s2235_s15  }
  0x37   :  { %2224 = dma.done.wait [#allocation4], 256  }
  0x38   :  { %2225 = vsyncadd [#allocation4], 4294967040 }
  0x39   :  { %2226 = dma.done.wait [#allocation7], 1024  }
  0x3a   :  { %2227 = vsyncadd [#allocation7], 4294966272 }
  0x3b   :  { %2228 = dma.done.wait [#allocation10], 1024  }
  0x3c   :  { %2229 = vsyncadd [#allocation10], 4294966272  ;;  %v199_v0 = vld [vmem:[#allocation8 + $0x18] sm:$0xff]  ;;  %v198_v2 = vld [vmem:[#allocation8 + $0x10] sm:$0xff]  ;;  %vm114_vm0 = vcmask 261120   ;;  %v2239_v10 = vmov 0.0  }
  0x3d   :  { %v106_v1 = vld [vmem:[#allocation6 + $0x18] sm:$0xff]  ;;  %1944 = vmatprep.subr.mxu1 %v199_v0  ;;  %v105_v3 = vld [vmem:[#allocation6 + $0x10] sm:$0xff]  ;;  %v197_v4 = vld [vmem:[#allocation8 + $0x8] sm:$0xff]  ;;  %vm2240_vm1 = vmmov 0   ;;  %vm368_vm2 = vcmask 64512   ;;  %s2241_s16 = smov 120  }
  0x3e   :  { %1933 = vmatprep.subr.mxu0 %v106_v1  ;;  %1945 = vmatpush3.msra.mxu1 %v199_v0  ;;  %v104_v5 = vld [vmem:[#allocation6 + $0x8] sm:$0xff]  ;;  %v196_v6 = vld [vmem:[#allocation8] sm:$0xff]  ;;  %v2327_v8 = vld [vmem:[#allocation3] sm:$0xff]  ;;  %s2245_s19 = smov 24   ;;  %vm702_vm3 = vcmask 130112   ;;  %vm874_vm4 = vcmask 195712  }
  0x3f   :  { %1934 = vmatpush3.msra.mxu0 %v106_v1  ;;  %1946 = vmatprep.subr.mxu1 %v198_v2  ;;  %v103_v7 = vld [vmem:[#allocation6] sm:$0xff]  ;;  %v2329_v9 = vld [vmem:[#allocation3 + $0x8] sm:$0xff]  ;;  %v284_v22 = vld [vmem:[#allocation9 + $0x10] sm:$0xff]  ;;  %vm1046_vm5 = vcmask 261312   ;;  %s2246_s22 = smov [#allocation12]  }
  0x40   :  { %1935 = vmatprep.subr.mxu0 %v105_v3  ;;  %1947 = vmatpush3.msra.mxu1 %v198_v2  ;;  %v1844_v13 = vld [vmem:[%s2524_s5] ss:$0 sm:$0xff]  ;;  %s2242_s5 = smov 112   ;;  %v285_v21 = vld [vmem:[#allocation9 + $0x18] sm:$0xff]  ;;  %v283_v23 = vld [vmem:[#allocation9 + $0x8] sm:$0xff]  ;;  %s1827_s23 = sshll.u32 %s2246_s22, 4  ;;  %s1828_s23 = int_to_ptr.vmem [resolvable:$true] %s1827_s23 }
  0x41   :  { %1936 = vmatpush3.msra.mxu0 %v105_v3  ;;  %1948 = vmatprep.subr.mxu1 %v197_v4  ;;  %v1841_v15 = vld [vmem:[%s2523_s4] ss:$0 sm:$0xff]  ;;  %s2243_s4 = smov 104   ;;  %s2204_s24 = scalar_lea.vmem %s1828_s23, 256 }
  0x42   :  { %1937 = vmatprep.subr.mxu0 %v104_v5  ;;  %1949 = vmatpush3.msra.mxu1 %v197_v4  ;;  %v282_v24 = vld [vmem:[#allocation9] sm:$0xff]  ;;  %p2205_p11 = scmp.ne.s32.totalorder %s1828_s23, %s2204_s24  ;;  %p2209_p12 = scmp.lt.s32.totalorder %s1828_s23, %s1828_s23 }
  0x43   :  { %1938 = vmatpush3.msra.mxu0 %v104_v5  ;;  %1950 = vmatprep.subr.mxu1 %v196_v6  ;;  %v1847_v35 = vld [vmem:[%s2525_s6] ss:$0 sm:$0xff]  ;;  %s2244_s6 = smov 16   ;;  %p2210_p13 = scmp.lt.s32.totalorder %s2204_s24, %s2204_s24 }
  0x44   :  { %1939 = vmatprep.subr.mxu0 %v103_v7  ;;  %1951 = vmatpush3.msra.mxu1 %v196_v6 }
  0x45   :  { %1952 = vmatprep.mubr.msk.f32.mxu1 %vm114_vm0, %v2327_v8  ;;  %1940 = vmatpush3.msra.mxu0 %v103_v7  ;;  %p2211_p0 = por %p2210_p13, %p2209_p12 }
  0x46   :  { %1941 = vmatprep.mubr.msk.f32.mxu0 %vm114_vm0, %v2327_v8  ;;  %1953 = vmatmul.mubr.msk.f32.vlgmr.msra.gmra.mxu1 %vm114_vm0, %v2329_v9 }
  0x47   :  { %1942 = vmatmul.mubr.msk.f32.vlgmr.msra.gmra.mxu0 %vm114_vm0, %v2329_v9  ;;  %1966 = vmatprep.subr.mxu1 %v2239_v10  ;;  %p2212_p1 = pnand %p2211_p0, %p2205_p11 }
  0x48   :  { %1963 = vmatprep.mubr.msk.f32.mxu0 %vm114_vm0, %v2327_v8  ;;  %1968 = vmatprep.mubr.msk.f32.mxu1 %vm2240_vm1, %v2239_v10 }
  0x49   :  { %1955 = vmatprep.subr.mxu0 %v285_v21 }
  0x4a   :  { %1956 = vmatpush3.msra.mxu0 %v285_v21 }
  0x4b   :  { %1957 = vmatprep.subr.mxu0 %v284_v22 }
  0x4c   :  { %1958 = vmatpush3.msra.mxu0 %v284_v22 }
  0x4d   :  { %1959 = vmatprep.subr.mxu0 %v283_v23 }
  0x4e   :  { %1960 = vmatpush3.msra.mxu0 %v283_v23 }
  0x4f   :  { %1961 = vmatprep.subr.mxu0 %v282_v24 }
  0x50   :  { %1962 = vmatpush3.msra.mxu0 %v282_v24 }
  0x51   :  { %1964 = vmatmul.mubr.msk.f32.vlgmr.msra.gmra.mxu0 %vm114_vm0, %v2329_v9  ;;  %1986 = vmatprep.subr.mxu0 %v2239_v10 }
  0x52   :  { %1988 = vmatprep.mubr.msk.f32.mxu0 %vm2240_vm1, %v2239_v10 }
 0x106   :  { %v1954_v11 = vpop.f32.mrf.mxu1 }
 0x107   :  { %v1943_v12 = vpop.f32.mrf.mxu0  ;;  %v279_v19 = vadd.f32 %v1954_v11, %v1844_v13 }
 0x108   :  { %v273_v14 = vpop.f32.mrf.mxu1  ;;  %v2361_v20 = vadd.f32 %v1943_v12, %v1841_v15 }
 0x109   :  { %v274_v16 = vadd.f32 %v1844_v13, %v273_v14  ;;  %v187_v17 = vpop.f32.mrf.mxu0 }
 0x10a   :  { %v188_v18 = vadd.f32 %v1841_v15, %v187_v17 }
 0x10b   :  { %533 = vrot.lane.b32.xlu1 %v274_v16, %s2241_s16  ;;  %1967 = vmatpush3.xpose.msk.msra.mxu1 %vm368_vm2, %v274_v16 }
 0x10c   :  { %1971 = vmatprep.subr.mxu1 %v2239_v10 }
 0x10e   :  { %1969 = vmatmul.mubr.msk.f32.vlgmr.msra.gmra.mxu1 %vm368_vm2, %v188_v18 }
 0x10f   :  { %531 = vrot.lane.b32.xlu1 %v188_v18, %s2241_s16  ;;  %1973 = vmatprep.mubr.msk.f32.mxu1 %vm2240_vm1, %v2239_v10 }
 0x111   :  { %v1965_v34 = vpop.f32.mrf.mxu0 }
 0x112   :  { %v2377_v36 = vadd.f32 %v1965_v34, %v1847_v35 }
 0x113   :  { %704 = vrot.lane.b32.xlu1 %v188_v18, %s2242_s5  ;;  %v359_v37 = vpop.f32.mrf.mxu0 }
 0x114   :  { %v2379_v38 = vadd.f32 %v1847_v35, %v359_v37 }
 0x116   :  { %1972 = vmatpush3.msra.mxu1 %v2379_v38 }
 0x117   :  { %878 = vrot.lane.b32.xlu1 %v274_v16, %s2243_s4  ;;  %1976 = vmatprep.subr.mxu1 %v2239_v10 }
 0x11b   :  { %876 = vrot.lane.b32.xlu1 %v188_v18, %s2243_s4 }
 0x11f   :  { %1212 = vrot.lane.b32.xlu1 %v279_v19, %s2241_s16 }
 0x123   :  { %1210 = vrot.lane.b32.xlu1 %v2361_v20, %s2241_s16 }
 0x127   :  { %1384 = vrot.lane.b32.xlu1 %v279_v19, %s2242_s5 }
 0x12b   :  { %1555 = vrot.lane.b32.xlu1 %v279_v19, %s2243_s4 }
 0x17d   :  { %v534_v39 = vpop.permute.xlu1 %533 }
 0x181   :  { %v532_v40 = vpop.permute.xlu1 %531 }
 0x185   :  { %v705_v41 = vpop.permute.xlu1 %704 }
 0x189   :  { %v879_v42 = vpop.permute.xlu1 %878 }
 0x18d   :  { %v877_v43 = vpop.permute.xlu1 %876 }
 0x191   :  { %v1213_v46 = vpop.permute.xlu1 %1212 }
 0x195   :  { %v1211_v47 = vpop.permute.xlu1 %1210 }
 0x199   :  { %v1385_v50 = vpop.permute.xlu1 %1384 }
 0x19d   :  { %v1556_v52 = vpop.permute.xlu1 %1555 }
 0x1ce   :  { %v441_v25 = vpop.f32.mrf.mxu1 }
 0x1cf   :  { %v445_v26 = vmul.f32 0.35355338, %v441_v25 }
 0x1d0   :  { %v1970_v27 = vpop.f32.mrf.mxu1 }
 0x1d1   :  { %v446_v28 = vsel %vm368_vm2, %v445_v26, -inf }
 0x1d2   :  { %447 = vmax.xlane.f32.xlu0 %v446_v28 }
 0x25b   :  { %v448_v29 = vpop.xlane.xlu0 %447 }
 0x25c   :  { %v449_v30 = vsub.f32 %v445_v26, %v448_v29 }
 0x25e   :  { %v450_v31 = vmul.f32 1.442695, %v449_v30 }
 0x260   :  { %2072 = vpow2.f32 %v450_v31 }
 0x26d   :  { %v2073_v32 = vpop.eup %2072 }
 0x26e   :  { %v452_v33 = vsel %vm368_vm2, %v2073_v32, 0.0 }
 0x26f   :  { %453 = vadd.xlane.f32.xlu0 %v452_v33 }
 0x285   :  { %706 = vrot.lane.b32.xlu0 %v274_v16, %s2242_s5 }
 0x289   :  { %1382 = vrot.lane.b32.xlu0 %v2361_v20, %s2242_s5 }
 0x28d   :  { %1553 = vrot.lane.b32.xlu0 %v2361_v20, %s2243_s4 }
 0x2f8   :  { %v454_v44 = vpop.xlane.xlu0 %453 }
 0x2f9   :  { %2074 = vrcp.f32 %v454_v44 }
 0x2fc   :  { %v707_v45 = vpop.permute.xlu0 %706 }
 0x2fd   :  { %1987 = vmatpush3.xpose.msk.msra.mxu0 %vm368_vm2, %v707_v45 }
 0x2fe   :  { %1996 = vmatprep.subr.mxu0 %v2239_v10 }
 0x300   :  { %1989 = vmatmul.mubr.msk.f32.vlgmr.msra.gmra.mxu0 %vm368_vm2, %v705_v41  ;;  %v1383_v51 = vpop.permute.xlu0 %1382 }
 0x301   :  { %1997 = vmatpush3.xpose.msk.msra.mxu0 %vm368_vm2, %v879_v42  ;;  %1998 = vmatprep.mubr.msk.f32.mxu0 %vm2240_vm1, %v2239_v10 }
 0x302   :  { %2006 = vmatprep.subr.mxu0 %v2239_v10 }
 0x304   :  { %1999 = vmatmul.mubr.msk.f32.vlgmr.msra.gmra.mxu0 %vm368_vm2, %v877_v43  ;;  %v1554_v53 = vpop.permute.xlu0 %1553 }
 0x305   :  { %2007 = vmatpush3.xpose.msk.msra.mxu0 %vm368_vm2, %v279_v19  ;;  %2008 = vmatprep.mubr.msk.f32.mxu0 %vm2240_vm1, %v2239_v10 }
 0x306   :  { %v2075_v48 = vpop.eup %2074  ;;  %2016 = vmatprep.subr.mxu0 %v2239_v10 }
 0x307   :  { %v456_v49 = vmul.f32 %v2075_v48, %v2073_v32 }
 0x308   :  { %2009 = vmatmul.mubr.msk.f32.vlgmr.msra.gmra.mxu0 %vm368_vm2, %v2361_v20 }
 0x309   :  { %1974 = vmatmul.mubr.msk.f32.vlgmr.msra.gmra.mxu1 %vm368_vm2, %v456_v49  ;;  %2017 = vmatpush3.xpose.msk.msra.mxu0 %vm368_vm2, %v1213_v46 }
 0x30a   :  { %1977 = vmatpush3.xpose.msk.msra.mxu1 %vm368_vm2, %v534_v39  ;;  %2018 = vmatprep.mubr.msk.f32.mxu0 %vm2240_vm1, %v2239_v10 }
 0x30b   :  { %1978 = vmatprep.mubr.msk.f32.mxu1 %vm2240_vm1, %v2239_v10  ;;  %2026 = vmatprep.subr.mxu0 %v2239_v10 }
 0x30c   :  { %2019 = vmatmul.mubr.msk.f32.vlgmr.msra.gmra.mxu0 %vm368_vm2, %v1211_v47  ;;  %1981 = vmatprep.subr.mxu1 %v2239_v10 }
 0x30d   :  { %1979 = vmatmul.mubr.msk.f32.vlgmr.msra.gmra.mxu1 %vm368_vm2, %v532_v40  ;;  %2027 = vmatpush3.xpose.msk.msra.mxu0 %vm368_vm2, %v1385_v50 }
 0x30e   :  { %2028 = vmatprep.mubr.msk.f32.mxu0 %vm2240_vm1, %v2239_v10  ;;  %2036 = vmatprep.subr.mxu0 %v2239_v10 }
 0x30f   :  { %1983 = vmatprep.mubr.msk.f32.mxu1 %vm2240_vm1, %v2239_v10 }
 0x310   :  { %2029 = vmatmul.mubr.msk.f32.vlgmr.msra.gmra.mxu0 %vm368_vm2, %v1383_v51 }
 0x311   :  { %2037 = vmatpush3.xpose.msk.msra.mxu0 %vm368_vm2, %v1556_v52  ;;  %2038 = vmatprep.mubr.msk.f32.mxu0 %vm2240_vm1, %v2239_v10 }
 0x314   :  { %2039 = vmatmul.mubr.msk.f32.vlgmr.msra.gmra.mxu0 %vm368_vm2, %v1554_v53 }
 0x3c0   :  { %v778_v54 = vpop.f32.mrf.mxu0 }
 0x3c1   :  { %v782_v55 = vmul.f32 0.35355338, %v778_v54 }
 0x3c2   :  { %v1990_v56 = vpop.f32.mrf.mxu0 }
 0x3c3   :  { %v783_v57 = vsel %vm368_vm2, %v782_v55, -inf }
 0x3c4   :  { %784 = vmax.xlane.f32.xlu0 %v783_v57  ;;  %v950_v58 = vpop.f32.mrf.mxu0 }
 0x3c5   :  { %v954_v59 = vmul.f32 0.35355338, %v950_v58 }
 0x3c6   :  { %v2000_v60 = vpop.f32.mrf.mxu0 }
 0x3c7   :  { %v955_v61 = vsel %vm368_vm2, %v954_v59, -inf }
 0x3c8   :  { %956 = vmax.xlane.f32.xlu0 %v955_v61  ;;  %v1120_v62 = vpop.f32.mrf.mxu0 }
 0x3c9   :  { %v526_v63 = vpop.f32.mrf.mxu1  ;;  %v1124_v12 = vmul.f32 0.35355338, %v1120_v62 }
 0x3ca   :  { %530 = vst.msk [vmem:[#allocation2] sm:$0xff] %vm368_vm2, %v526_v63  ;;  %v2010_v0 = vpop.f32.mrf.mxu0 }
 0x3cb   :  { %v1975_v1 = vpop.f32.mrf.mxu1  ;;  %v1125_v18 = vsel %vm368_vm2, %v1124_v12, -inf }
 0x3cc   :  { %v1284_v2 = vpop.f32.mrf.mxu0 }
 0x3cd   :  { %v1288_v3 = vmul.f32 0.35355338, %v1284_v2  ;;  %v605_v4 = vpop.f32.mrf.mxu1 }
 0x3ce   :  { %v2427_v5 = vmul.f32 0.35355338, %v605_v4  ;;  %v2020_v6 = vpop.f32.mrf.mxu0 }
 0x3cf   :  { %v1980_v7 = vpop.f32.mrf.mxu1  ;;  %v1289_v11 = vsel %vm368_vm2, %v1288_v3, -inf }
 0x3d0   :  { %1290 = vmax.xlane.f32.xlu0 %v1289_v11  ;;  %v1456_v13 = vpop.f32.mrf.mxu0  ;;  %v610_v14 = vsel %vm368_vm2, %v2427_v5, -inf }
 0x3d1   :  { %611 = vmax.xlane.f32.xlu1 %v610_v14  ;;  %v1460_v16 = vmul.f32 0.35355338, %v1456_v13 }
 0x3d2   :  { %v2030_v15 = vpop.f32.mrf.mxu0 }
 0x3d3   :  { %v1461_v22 = vsel %vm368_vm2, %v1460_v16, -inf }
 0x3d4   :  { %v1627_v17 = vpop.f32.mrf.mxu0 }
 0x3d5   :  { %v1631_v19 = vmul.f32 0.35355338, %v1627_v17  ;;  %1126 = vmax.xlane.f32.xlu1 %v1125_v18 }
 0x3d6   :  { %v2040_v20 = vpop.f32.mrf.mxu0 }
 0x3d7   :  { %v1632_v21 = vsel %vm368_vm2, %v1631_v19, -inf }
 0x3d8   :  { %1633 = vmax.xlane.f32.xlu0 %v1632_v21 }
 0x3d9   :  { %1462 = vmax.xlane.f32.xlu1 %v1461_v22 }
 0x44d   :  { %v785_v23 = vpop.xlane.xlu0 %784 }
 0x44e   :  { %v786_v24 = vsub.f32 %v782_v55, %v785_v23 }
 0x450   :  { %v787_v25 = vmul.f32 1.442695, %v786_v24 }
 0x451   :  { %v957_v26 = vpop.xlane.xlu0 %956 }
 0x452   :  { %2076 = vpow2.f32 %v787_v25  ;;  %v958_v27 = vsub.f32 %v954_v59, %v957_v26 }
 0x454   :  { %v959_v28 = vmul.f32 1.442695, %v958_v27 }
 0x456   :  { %2078 = vpow2.f32 %v959_v28 }
 0x459   :  { %v1291_v29 = vpop.xlane.xlu0 %1290 }
 0x45a   :  { %v1292_v30 = vsub.f32 %v1288_v3, %v1291_v29  ;;  %v612_v31 = vpop.xlane.xlu1 %611 }
 0x45b   :  { %v613_v56 = vsub.f32 %v2427_v5, %v612_v31  ;;  %v1729_v31 = vld [vmem:[#allocation11 + $0x18] sm:$0xff] }
 0x45c   :  { %v1293_v32 = vmul.f32 1.442695, %v1292_v30  ;;  %2046 = vmatprep.subr.mxu0 %v1729_v31 }
 0x45d   :  { %v614_v57 = vmul.f32 1.442695, %v613_v56  ;;  %2047 = vmatpush3.msra.mxu0 %v1729_v31 }
 0x45e   :  { %2080 = vpow2.f32 %v1293_v32  ;;  %v1127_v33 = vpop.xlane.xlu1 %1126  ;;  %v1728_v32 = vld [vmem:[#allocation11 + $0x10] sm:$0xff] }
 0x45f   :  { %v2435_v34 = vpop.eup %2076  ;;  %v1128_v35 = vsub.f32 %v1124_v12, %v1127_v33  ;;  %v1727_v33 = vld [vmem:[#allocation11 + $0x8] sm:$0xff]  ;;  %2048 = vmatprep.subr.mxu0 %v1728_v32 }
 0x460   :  { %v789_v37 = vsel %vm368_vm2, %v2435_v34, 0.0  ;;  %2049 = vmatpush3.msra.mxu0 %v1728_v32 }
 0x461   :  { %v1129_v39 = vmul.f32 1.442695, %v1128_v35  ;;  %790 = vadd.xlane.f32.xlu0 %v789_v37  ;;  %v1634_v40 = vpop.xlane.xlu0 %1633  ;;  %v1726_v35 = vld [vmem:[#allocation11] sm:$0xff]  ;;  %2050 = vmatprep.subr.mxu0 %v1727_v33 }
 0x462   :  { %v1635_v41 = vsub.f32 %v1631_v19, %v1634_v40  ;;  %v1463_v42 = vpop.xlane.xlu1 %1462  ;;  %2051 = vmatpush3.msra.mxu0 %v1727_v33 }
 0x463   :  { %v2439_v43 = vpop.eup %2078  ;;  %2082 = vpow2.f32 %v1129_v39  ;;  %v1464_v44 = vsub.f32 %v1460_v16, %v1463_v42  ;;  %2052 = vmatprep.subr.mxu0 %v1726_v35 }
 0x464   :  { %v1636_v45 = vmul.f32 1.442695, %v1635_v41  ;;  %v961_v46 = vsel %vm368_vm2, %v2439_v43, 0.0  ;;  %2053 = vmatpush3.msra.mxu0 %v1726_v35 }
 0x465   :  { %v1465_v47 = vmul.f32 1.442695, %v1464_v44  ;;  %962 = vadd.xlane.f32.xlu1 %v961_v46 }
 0x466   :  { %2084 = vpow2.f32 %v1636_v45 }
 0x467   :  { %2086 = vpow2.f32 %v1465_v47 }
 0x468   :  { %2088 = vpow2.f32 %v614_v57 }
 0x46b   :  { %v2443_v48 = vpop.eup %2080 }
 0x46c   :  { %v1295_v49 = vsel %vm368_vm2, %v2443_v48, 0.0 }
 0x46d   :  { %1296 = vadd.xlane.f32.xlu1 %v1295_v49 }
 0x470   :  { %v2083_v50 = vpop.eup %2082 }
 0x471   :  { %v1131_v51 = vsel %vm368_vm2, %v2083_v50, 0.0 }
 0x472   :  { %1132 = vadd.xlane.f32.xlu0 %v1131_v51  ;;  %v1874_v51 = vld [vmem:[%s2527_s8] ss:$0 sm:$0xff] }
 0x473   :  { %v2448_v52 = vpop.eup %2084 }
 0x474   :  { %v2450_v53 = vpop.eup %2086  ;;  %v1638_v54 = vsel %vm368_vm2, %v2448_v52, 0.0 }
 0x475   :  { %1639 = vadd.xlane.f32.xlu1 %v1638_v54  ;;  %v1467_v55 = vsel %vm368_vm2, %v2450_v53, 0.0  ;;  %v2089_v58 = vpop.eup %2088 }
 0x476   :  { %1468 = vadd.xlane.f32.xlu0 %v1467_v55  ;;  %v616_v59 = vsel %vm368_vm2, %v2089_v58, 0.0 }
 0x486   :  { %794 = vrot.lane.b32.xlu1 %v2379_v38, %s2242_s5 }
 0x48c   :  { %622 = vrot.lane.b32.xlu0 %v2379_v38, %s2241_s16 }
 0x490   :  { %1301 = vrot.lane.b32.xlu0 %v2377_v36, %s2241_s16 }
 0x494   :  { %1643 = vrot.lane.b32.xlu0 %v2377_v36, %s2243_s4 }
 0x4aa   :  { %617 = vadd.xlane.f32.xlu1 %v616_v59 }
 0x4bb   :  { %966 = vrot.lane.b32.xlu1 %v2379_v38, %s2243_s4 }
 0x4bf   :  { %1472 = vrot.lane.b32.xlu1 %v2377_v36, %s2242_s5 }
 0x4ea   :  { %v791_v60 = vpop.xlane.xlu0 %790 }
 0x4ee   :  { %v963_v0 = vpop.xlane.xlu1 %962 }
 0x4f6   :  { %v1297_v1 = vpop.xlane.xlu1 %1296 }
 0x4fb   :  { %v1133_v61 = vpop.xlane.xlu0 %1132 }
 0x4fe   :  { %v1640_v2 = vpop.xlane.xlu1 %1639 }
 0x4ff   :  { %v1469_v62 = vpop.xlane.xlu0 %1468 }
 0x502   :  { %v795_v3 = vpop.permute.xlu1 %794 }
 0x503   :  { %v623_v63 = vpop.permute.xlu0 %622 }
 0x504   :  { %1982 = vmatpush3.msra.mxu1 %v623_v63 }
 0x505   :  { %1991 = vmatprep.subr.mxu1 %v2239_v10 }
 0x507   :  { %v1302_v17 = vpop.permute.xlu0 %1301 }
 0x50b   :  { %v1644_v22 = vpop.permute.xlu0 %1643 }
 0x533   :  { %v618_v4 = vpop.xlane.xlu1 %617 }
 0x534   :  { %2090 = vrcp.f32 %v618_v4 }
 0x535   :  { %2092 = vrcp.f32 %v791_v60 }
 0x536   :  { %2094 = vrcp.f32 %v963_v0 }
 0x537   :  { %2096 = vrcp.f32 %v1133_v61  ;;  %v967_v12 = vpop.permute.xlu1 %966 }
 0x538   :  { %2098 = vrcp.f32 %v1297_v1 }
 0x539   :  { %2100 = vrcp.f32 %v1469_v62 }
 0x53a   :  { %2102 = vrcp.f32 %v1640_v2 }
 0x541   :  { %v2091_v38 = vpop.eup %2090 }
 0x542   :  { %v620_v5 = vmul.f32 %v2091_v38, %v2089_v58  ;;  %v2093_v6 = vpop.eup %2092 }
 0x543   :  { %v793_v7 = vmul.f32 %v2093_v6, %v2435_v34  ;;  %v2095_v11 = vpop.eup %2094 }
 0x544   :  { %1984 = vmatmul.mubr.msk.f32.vlgmr.msra.gmra.mxu1 %vm368_vm2, %v620_v5  ;;  %v965_v13 = vmul.f32 %v2095_v11, %v2439_v43  ;;  %v2097_v14 = vpop.eup %2096 }
 0x545   :  { %1992 = vmatpush3.msra.mxu1 %v795_v3  ;;  %1993 = vmatprep.mubr.msk.f32.mxu1 %vm2240_vm1, %v2239_v10  ;;  %v1135_v15 = vmul.f32 %v2097_v14, %v2083_v50  ;;  %v2099_v16 = vpop.eup %2098 }
 0x546   :  { %2001 = vmatprep.subr.mxu1 %v2239_v10  ;;  %v1299_v18 = vmul.f32 %v2099_v16, %v2443_v48  ;;  %v2101_v19 = vpop.eup %2100 }
 0x547   :  { %v1471_v20 = vmul.f32 %v2101_v19, %v2450_v53  ;;  %v2103_v21 = vpop.eup %2102 }
 0x548   :  { %1994 = vmatmul.mubr.msk.f32.vlgmr.msra.gmra.mxu1 %vm368_vm2, %v793_v7  ;;  %v1642_v23 = vmul.f32 %v2103_v21, %v2448_v52 }
 0x549   :  { %2002 = vmatpush3.msra.mxu1 %v967_v12  ;;  %2003 = vmatprep.mubr.msk.f32.mxu1 %vm2240_vm1, %v2239_v10 }
 0x54a   :  { %2011 = vmatprep.subr.mxu1 %v2239_v10 }
 0x54c   :  { %2004 = vmatmul.mubr.msk.f32.vlgmr.msra.gmra.mxu1 %vm368_vm2, %v965_v13 }
 0x54d   :  { %2012 = vmatpush3.msra.mxu1 %v2377_v36  ;;  %2013 = vmatprep.mubr.msk.f32.mxu1 %vm2240_vm1, %v2239_v10  ;;  %v1473_v36 = vpop.permute.xlu1 %1472 }
 0x54e   :  { %2021 = vmatprep.subr.mxu1 %v2239_v10 }
 0x550   :  { %2014 = vmatmul.mubr.msk.f32.vlgmr.msra.gmra.mxu1 %vm368_vm2, %v1135_v15 }
 0x551   :  { %2022 = vmatpush3.msra.mxu1 %v1302_v17  ;;  %2023 = vmatprep.mubr.msk.f32.mxu1 %vm2240_vm1, %v2239_v10 }
 0x552   :  { %2031 = vmatprep.subr.mxu1 %v2239_v10 }
 0x554   :  { %2024 = vmatmul.mubr.msk.f32.vlgmr.msra.gmra.mxu1 %vm368_vm2, %v1299_v18 }
 0x555   :  { %2032 = vmatpush3.msra.mxu1 %v1473_v36  ;;  %2033 = vmatprep.mubr.msk.f32.mxu1 %vm2240_vm1, %v2239_v10 }
 0x556   :  { %2041 = vmatprep.subr.mxu1 %v2239_v10 }
 0x558   :  { %2034 = vmatmul.mubr.msk.f32.vlgmr.msra.gmra.mxu1 %vm368_vm2, %v1471_v20 }
 0x559   :  { %2042 = vmatpush3.msra.mxu1 %v1644_v22  ;;  %2043 = vmatprep.mubr.msk.f32.mxu1 %vm2240_vm1, %v2239_v10 }
 0x55c   :  { %2044 = vmatmul.mubr.msk.f32.vlgmr.msra.gmra.mxu1 %vm368_vm2, %v1642_v23 }
 0x604   :  { %v694_v24 = vpop.f32.mrf.mxu1 }
 0x605   :  { %699 = vrot.lane.b32.xlu1 %v694_v24, %s2235_s15 }
 0x606   :  { %v1985_v25 = vpop.f32.mrf.mxu1 }
 0x608   :  { %v866_v26 = vpop.f32.mrf.mxu1 }
 0x609   :  { %871 = vrot.lane.b32.xlu0 %v866_v26, %s2244_s6 }
 0x60a   :  { %v1995_v27 = vpop.f32.mrf.mxu1 }
 0x60c   :  { %v1038_v28 = vpop.f32.mrf.mxu1 }
 0x60d   :  { %1043 = vrot.lane.b32.xlu0 %v1038_v28, %s2245_s19 }
 0x60e   :  { %v2005_v29 = vpop.f32.mrf.mxu1 }
 0x610   :  { %v1205_v30 = vpop.f32.mrf.mxu1 }
 0x611   :  { %1209 = vst.msk [vmem:[#allocation2 + $0x8] sm:$0xff] %vm368_vm2, %v1205_v30 }
 0x612   :  { %v2015_v10 = vpop.f32.mrf.mxu1 }
 0x614   :  { %v1373_v34 = vpop.f32.mrf.mxu1 }
 0x615   :  { %1378 = vrot.lane.b32.xlu1 %v1373_v34, %s2235_s15 }
 0x616   :  { %v2025_v37 = vpop.f32.mrf.mxu1 }
 0x618   :  { %v1544_v39 = vpop.f32.mrf.mxu1 }
 0x619   :  { %1549 = vrot.lane.b32.xlu1 %v1544_v39, %s2244_s6 }
 0x61a   :  { %v2035_v40 = vpop.f32.mrf.mxu1 }
 0x61c   :  { %v1715_v41 = vpop.f32.mrf.mxu1 }
 0x61d   :  { %1720 = vrot.lane.b32.xlu0 %v1715_v41, %s2245_s19 }
 0x61e   :  { %v2045_v42 = vpop.f32.mrf.mxu1 }
 0x677   :  { %v700_v43 = vpop.permute.xlu1 %699 }
 0x678   :  { %703 = vst.msk [vmem:[#allocation2] sm:$0xff] %vm702_vm3, %v700_v43 }
 0x67b   :  { %v872_v44 = vpop.permute.xlu0 %871 }
 0x67c   :  { %875 = vst.msk [vmem:[#allocation2] sm:$0xff] %vm874_vm4, %v872_v44 }
 0x67f   :  { %v1044_v45 = vpop.permute.xlu0 %1043 }
 0x680   :  { %1047 = vst.msk [vmem:[#allocation2] sm:$0xff] %vm1046_vm5, %v1044_v45 }
 0x687   :  { %v1379_v46 = vpop.permute.xlu1 %1378  ;;  %v1724_v47 = vld [vmem:[#allocation2] sm:$0xff] }
 0x688   :  { %1381 = vst.msk [vmem:[#allocation2 + $0x8] sm:$0xff] %vm702_vm3, %v1379_v46  ;;  %2054 = vmatprep.mubr.msk.f32.mxu0 %vm114_vm0, %v1724_v47 }
 0x68b   :  { %v1550_v48 = vpop.permute.xlu1 %1549 }
 0x68c   :  { %1552 = vst.msk [vmem:[#allocation2 + $0x8] sm:$0xff] %vm874_vm4, %v1550_v48 }
 0x68f   :  { %v1721_v49 = vpop.permute.xlu0 %1720 }
 0x690   :  { %1723 = vst.msk [vmem:[#allocation2 + $0x8] sm:$0xff] %vm1046_vm5, %v1721_v49 }
 0x697   :  { %v1725_v50 = vld [vmem:[#allocation2 + $0x8] sm:$0xff] }
 0x698   :  { %2055 = vmatmul.mubr.msk.f32.vlgmr.msra.gmra.mxu0 %vm114_vm0, %v1725_v50 }
 0x758   :  { %v2056_v52 = vpop.f32.mrf.mxu0 }
 0x759   :  { %v1815_v53 = vadd.f32 %v2056_v52, %v1874_v51 }
 0x75a   :  { %v1809_v54 = vpop.f32.mrf.mxu0 }
 0x75b   :  { %v1819_v55 = vadd.f32 %v1815_v53, %v2329_v9  ;;  %v1810_v56 = vadd.f32 %v1874_v51, %v1809_v54 }
 0x75d   :  { %1821 = vst.msk [vmem:[#allocation12 + $0x8] sm:$0xff] %vm114_vm0, %v1819_v55  ;;  %v1818_v57 = vadd.f32 %v1810_v56, %v2327_v8 }
 0x75f   :  { %1820 = vst.msk [vmem:[#allocation12] sm:$0xff] %vm114_vm0, %v1818_v57 }
 0x760   :  { %2215 = shalt.err (!%p2212_p1)
}
 0x761   :  { %1833 = dma.vmem_to_hbm [thread:$0]  %s1828_s23, 256, %s2528_s9, [#allocation5], %s2234_s14, %s2234_s14, %s2235_s15  }
 0x762   :  { %2230 = dma.done.wait [#allocation5], 256  }
 0x763   :  { %2231 = vsyncadd [#allocation5], 4294967040 }
 0x764   :  { %1837 = vsyncpa [#allocation4], 1 }
 0x765   :  { %1838 = vsyncpa [#allocation7], 1 }
 0x766   :  { %1839 = vsyncpa [#allocation10], 1 }
 0x767   :  { %1840 = vsyncpa [#allocation5], 1 }

</bundles_post_ra>
